<compile_context>
chip_gen: v7x
topology: tpu7x:2x2x1
jax: 0.10.0
libtpu: 0.0.40
codegen_flags: <defaults>
</compile_context>

<pallas_src>
import jax
import jax.numpy as jnp
from jax.experimental import pallas as pl
from jax.experimental.pallas import tpu as pltpu


def _conv_stats_kernel(p_ref, w_ref, conv_ref, sum_ref, sq_ref):
    """Pass 1: conv tile + per-channel sum / sum-of-squares accumulation.

    p_ref:    (K, TM)   bf16 im2col patch tile
    w_ref:    (Cout, K) bf16 conv weight (full, resident)
    conv_ref: (Cout, TM) f32 conv output tile (lane-dense)
    sum_ref / sq_ref: (Cout, 1) f32 accumulators, resident across the grid.
    """
    conv = jnp.dot(w_ref[...], p_ref[...], preferred_element_type=jnp.float32)
    conv_ref[...] = conv

    @pl.when(pl.program_id(0) == 0)
    def _():
        sum_ref[...] = jnp.zeros_like(sum_ref)
        sq_ref[...] = jnp.zeros_like(sq_ref)

    sum_ref[...] += jnp.sum(conv, axis=1, keepdims=True)
    sq_ref[...] += jnp.sum(conv * conv, axis=1, keepdims=True)


def _bn_silu_kernel(conv_ref, scale_ref, shift_ref, out_ref):
    """Pass 2: y = conv*scale + shift ; out = y * sigmoid(y)."""
    y = conv_ref[...] * scale_ref[...] + shift_ref[...]
    out_ref[...] = y * jax.nn.sigmoid(y)


def downsample_layer(x, weight, bias, gamma, beta, *, stride=2, padding=1, eps=1e-5):
    """x: (N, Cin, H, W) f32; weight: (Cout, Cin, KH, KW); bias/gamma/beta: (Cout,)."""
    del bias  # Exactly cancelled by BatchNorm's mean subtraction (training mode).

    N, Cin, H, W = x.shape
    Cout, _, KH, KW = weight.shape
    OH = (H + 2 * padding - KH) // stride + 1
    OW = (W + 2 * padding - KW) // stride + 1
    M = N * OH * OW
    K = Cin * KH * KW

    # --- glue: pad + im2col in (K, M) orientation, cast to bf16 ---
    x_pad = jnp.pad(x, ((0, 0), (0, 0), (padding, padding), (padding, padding)))
    cols = []
    for kh in range(KH):
        for kw in range(KW):
            cols.append(
                x_pad[:, :, kh:kh + stride * OH:stride, kw:kw + stride * OW:stride]
            )
    patches = jnp.stack(cols, axis=0)              # (KH*KW, N, Cin, OH, OW)
    patches = patches.transpose(2, 0, 1, 3, 4)     # (Cin, KH*KW, N, OH, OW)
    patches = patches.reshape(K, M).astype(jnp.bfloat16)

    # Tile M: multiple of 128 lanes; zero-pad M (zeros add nothing to sum/sumsq,
    # padded output columns are sliced away below).
    TM = min(512, ((M + 127) // 128) * 128)
    M_pad = ((M + TM - 1) // TM) * TM
    if M_pad != M:
        patches = jnp.pad(patches, ((0, 0), (0, M_pad - M)))
    n_tiles = M_pad // TM

    w_ck = weight.reshape(Cout, K).astype(jnp.bfloat16)   # (Cout, K), matches patch k-order

    vmem_limit = 48 * 1024 * 1024  # safe on 64 MiB (v7x) and 128 MiB (v5e/v6e) parts

    # --- pass 1: conv + per-channel sum / sumsq ---
    conv_cm, csum, csq = pl.pallas_call(
        _conv_stats_kernel,
        grid=(n_tiles,),
        in_specs=[
            pl.BlockSpec((K, TM), lambda i: (0, i)),
            pl.BlockSpec((Cout, K), lambda i: (0, 0)),
        ],
        out_specs=(
            pl.BlockSpec((Cout, TM), lambda i: (0, i)),
            pl.BlockSpec((Cout, 1), lambda i: (0, 0)),
            pl.BlockSpec((Cout, 1), lambda i: (0, 0)),
        ),
        out_shape=(
            jax.ShapeDtypeStruct((Cout, M_pad), jnp.float32),
            jax.ShapeDtypeStruct((Cout, 1), jnp.float32),
            jax.ShapeDtypeStruct((Cout, 1), jnp.float32),
        ),
        compiler_params=pltpu.CompilerParams(
            dimension_semantics=("arbitrary",),  # stats blocks are grid-resident
            vmem_limit_bytes=vmem_limit),
    )(patches, w_ck)

    # --- tiny per-channel math (Cout elements): mean/var -> scale/shift ---
    mean = csum[:, 0] / M
    var = jnp.maximum(csq[:, 0] / M - mean * mean, 0.0)
    inv_std = jax.lax.rsqrt(var + eps)
    scale_v = gamma.astype(jnp.float32) * inv_std
    shift_v = beta.astype(jnp.float32) - mean * scale_v
    scale = scale_v.reshape(Cout, 1)
    shift = shift_v.reshape(Cout, 1)

    # --- pass 2: normalize + SiLU (lane-dense (Cout, TM) tiles) ---
    out_cm = pl.pallas_call(
        _bn_silu_kernel,
        grid=(n_tiles,),
        in_specs=[
            pl.BlockSpec((Cout, TM), lambda i: (0, i)),
            pl.BlockSpec((Cout, 1), lambda i: (0, 0)),
            pl.BlockSpec((Cout, 1), lambda i: (0, 0)),
        ],
        out_specs=pl.BlockSpec((Cout, TM), lambda i: (0, i)),
        out_shape=jax.ShapeDtypeStruct((Cout, M_pad), jnp.float32),
        compiler_params=pltpu.CompilerParams(
            dimension_semantics=("parallel",),
            vmem_limit_bytes=vmem_limit),
    )(conv_cm, scale, shift)

    # (Cout, M) -> (Cout, N, OH, OW) -> NCHW
    out = out_cm[:, :M].reshape(Cout, N, OH, OW).transpose(1, 0, 2, 3)
    return out


def _reference(x, weight, bias, gamma, beta, *, stride=2, padding=1, eps=1e-5):
    conv = jax.lax.conv_general_dilated(
        x, weight, window_strides=(stride, stride),
        padding=[(padding, padding), (padding, padding)],
        dimension_numbers=("NCHW", "OIHW", "NCHW"))
    conv = conv + bias[None, :, None, None]
    mean = conv.mean(axis=(0, 2, 3), keepdims=True)
    var = ((conv - mean) ** 2).mean(axis=(0, 2, 3), keepdims=True)
    y = (conv - mean) * jax.lax.rsqrt(var + eps) * gamma[None, :, None, None] \
        + beta[None, :, None, None]
    return y * jax.nn.sigmoid(y)


if __name__ == "__main__":
    # Small shapes consistent with the module: n_in=4, n_out=8, 16x16 spatial.
    n_in, n_out = 4, 8
    N, H, W = 2, 16, 16
    KH = KW = 4

    key = jax.random.PRNGKey(0)
    kx, kw, kb, kg, kbeta = jax.random.split(key, 5)
    x = jax.random.normal(kx, (N, n_in, H, W), dtype=jnp.float32)
    weight = 0.1 * jax.random.normal(kw, (n_out, n_in, KH, KW), dtype=jnp.float32)
    bias = 0.1 * jax.random.normal(kb, (n_out,), dtype=jnp.float32)
    gamma = 1.0 + 0.1 * jax.random.normal(kg, (n_out,), dtype=jnp.float32)
    beta = 0.1 * jax.random.normal(kbeta, (n_out,), dtype=jnp.float32)

    out = downsample_layer(x, weight, bias, gamma, beta)
    out = jax.block_until_ready(out)

    ref = _reference(x, weight, bias, gamma, beta)
    assert out.shape == (N, n_out, H // 2, W // 2), out.shape
    # Tolerance reflects bf16 matmul inputs (f32 accumulation); reference is full f32.
    assert bool(jnp.allclose(out, ref, rtol=2e-2, atol=2e-2)), "mismatch vs reference"

    print("KERNEL_OK")
</pallas_src>

<mosaic_0001>
module attributes {stable_mosaic.version = 11 : i64} {
  func.func @_conv_stats_kernel(%arg0: i32, %arg1: memref<64x128xbf16, #tpu.memory_space<vmem>>, %arg2: memref<8x64xbf16, #tpu.memory_space<vmem>>, %arg3: memref<8x128xf32, #tpu.memory_space<vmem>>, %arg4: memref<8x1xf32, #tpu.memory_space<vmem>>, %arg5: memref<8x1xf32, #tpu.memory_space<vmem>>) attributes {dimension_semantics = [#tpu.dimension_semantics<arbitrary>], iteration_bounds = array<i64: 1>, scalar_prefetch = 0 : i64, scratch_operands = 0 : i64, tpu.core_type = #tpu.core_type<tc>, window_params = [{transform_indices = @transform_0, window_bounds = array<i64: 64, 128>}, {pipeline_mode = #tpu.pipeline_mode<synchronous>, transform_indices = @transform_1, window_bounds = array<i64: 8, 64>}, {transform_indices = @transform_2, window_bounds = array<i64: 8, 128>}, {pipeline_mode = #tpu.pipeline_mode<synchronous>, transform_indices = @transform_3, window_bounds = array<i64: 8, 1>}, {pipeline_mode = #tpu.pipeline_mode<synchronous>, transform_indices = @transform_4, window_bounds = array<i64: 8, 1>}]} {
    %c0 = arith.constant 0 : index
    %c0_0 = arith.constant 0 : index
    %0 = vector.load %arg2[%c0, %c0_0] : memref<8x64xbf16, #tpu.memory_space<vmem>>, vector<8x64xbf16>
    %c0_1 = arith.constant 0 : index
    %c0_2 = arith.constant 0 : index
    %1 = vector.load %arg1[%c0_1, %c0_2] : memref<64x128xbf16, #tpu.memory_space<vmem>>, vector<64x128xbf16>
    %cst = arith.constant dense<0.000000e+00> : vector<8x128xf32>
    %2 = tpu.matmul %0, %1, %cst {dimension_numbers = #tpu.dot_dimension_numbers<[1], [0], [0], [1], [0, 0, 1, 1], [], []>} : vector<8x64xbf16>, vector<64x128xbf16>, vector<8x128xf32> -> vector<8x128xf32>
    %c0_3 = arith.constant 0 : index
    %c0_4 = arith.constant 0 : index
    %3 = vector.load %arg3[%c0_3, %c0_4] : memref<8x128xf32, #tpu.memory_space<vmem>>, vector<8x128xf32>
    tpu.vector_store %arg3[%c0_3, %c0_4], %2 {strides = array<i32>} : memref<8x128xf32, #tpu.memory_space<vmem>>, vector<8x128xf32>,
    %c0_i32 = arith.constant 0 : i32
    %4 = arith.cmpi eq, %arg0, %c0_i32 : i32
    %5 = arith.extui %4 : i1 to i32
    %c0_i32_5 = arith.constant 0 : i32
    %6 = arith.cmpi ne, %5, %c0_i32_5 : i32
    scf.if %6 {
      %cst_16 = arith.constant 0.000000e+00 : f32
      %18 = vector.broadcast %cst_16 : f32 to vector<8x1xf32>
      %c0_17 = arith.constant 0 : index
      %c0_18 = arith.constant 0 : index
      %19 = vector.load %arg4[%c0_17, %c0_18] : memref<8x1xf32, #tpu.memory_space<vmem>>, vector<8x1xf32>
      tpu.vector_store %arg4[%c0_17, %c0_18], %18 {strides = array<i32>} : memref<8x1xf32, #tpu.memory_space<vmem>>, vector<8x1xf32>,
      %cst_19 = arith.constant 0.000000e+00 : f32
      %20 = vector.broadcast %cst_19 : f32 to vector<8x1xf32>
      %c0_20 = arith.constant 0 : index
      %c0_21 = arith.constant 0 : index
      %21 = vector.load %arg5[%c0_20, %c0_21] : memref<8x1xf32, #tpu.memory_space<vmem>>, vector<8x1xf32>
      tpu.vector_store %arg5[%c0_20, %c0_21], %20 {strides = array<i32>} : memref<8x1xf32, #tpu.memory_space<vmem>>, vector<8x1xf32>,
    } else {
    }
    %c0_6 = arith.constant 0 : index
    %c0_7 = arith.constant 0 : index
    %7 = vector.load %arg4[%c0_6, %c0_7] : memref<8x1xf32, #tpu.memory_space<vmem>>, vector<8x1xf32>
    %cst_8 = arith.constant dense<0.000000e+00> : vector<8xf32>
    %8 = vector.multi_reduction <add>, %2, %cst_8 [1] : vector<8x128xf32> to vector<8xf32>
    %9 = vector.shape_cast %8 : vector<8xf32> to vector<8x1xf32>
    %10 = arith.addf %7, %9 : vector<8x1xf32>
    %c0_9 = arith.constant 0 : index
    %c0_10 = arith.constant 0 : index
    %11 = vector.load %arg4[%c0_9, %c0_10] : memref<8x1xf32, #tpu.memory_space<vmem>>, vector<8x1xf32>
    tpu.vector_store %arg4[%c0_9, %c0_10], %10 {strides = array<i32>} : memref<8x1xf32, #tpu.memory_space<vmem>>, vector<8x1xf32>,
    %c0_11 = arith.constant 0 : index
    %c0_12 = arith.constant 0 : index
    %12 = vector.load %arg5[%c0_11, %c0_12] : memref<8x1xf32, #tpu.memory_space<vmem>>, vector<8x1xf32>
    %13 = arith.mulf %2, %2 : vector<8x128xf32>
    %cst_13 = arith.constant dense<0.000000e+00> : vector<8xf32>
    %14 = vector.multi_reduction <add>, %13, %cst_13 [1] : vector<8x128xf32> to vector<8xf32>
    %15 = vector.shape_cast %14 : vector<8xf32> to vector<8x1xf32>
    %16 = arith.addf %12, %15 : vector<8x1xf32>
    %c0_14 = arith.constant 0 : index
    %c0_15 = arith.constant 0 : index
    %17 = vector.load %arg5[%c0_14, %c0_15] : memref<8x1xf32, #tpu.memory_space<vmem>>, vector<8x1xf32>
    tpu.vector_store %arg5[%c0_14, %c0_15], %16 {strides = array<i32>} : memref<8x1xf32, #tpu.memory_space<vmem>>, vector<8x1xf32>,
    return
  }
  func.func @transform_0(%arg0: i32) -> (i32, i32) {
    %c0_i32 = arith.constant 0 : i32
    %c0_i32_0 = arith.constant 0 : i32
    return %c0_i32, %arg0 : i32, i32
  }
  func.func @transform_1(%arg0: i32) -> (i32, i32) {
    %c0_i32 = arith.constant 0 : i32
    %c0_i32_0 = arith.constant 0 : i32
    %c0_i32_1 = arith.constant 0 : i32
    return %c0_i32, %c0_i32_0 : i32, i32
  }
  func.func @transform_2(%arg0: i32) -> (i32, i32) {
    %c0_i32 = arith.constant 0 : i32
    %c0_i32_0 = arith.constant 0 : i32
    return %c0_i32, %arg0 : i32, i32
  }
  func.func @transform_3(%arg0: i32) -> (i32, i32) {
    %c0_i32 = arith.constant 0 : i32
    %c0_i32_0 = arith.constant 0 : i32
    %c0_i32_1 = arith.constant 0 : i32
    return %c0_i32, %c0_i32_0 : i32, i32
  }
  func.func @transform_4(%arg0: i32) -> (i32, i32) {
    %c0_i32 = arith.constant 0 : i32
    %c0_i32_0 = arith.constant 0 : i32
    %c0_i32_1 = arith.constant 0 : i32
    return %c0_i32, %c0_i32_0 : i32, i32
  }
}

</mosaic_0001>

<bundles_post_ra>
// kernel: tpu_custom_call.1
= control target key start
LH: loop header
LB: loop body
LE: loop exit
PB: predicated region body
PF: predicated region fallthrough
CT: control target
= control target key end

     0   :  { %10 = vsyncpa [#allocation3], 0  ;;  %s358_s0 = inlined_call_operand.hbm [shape: bf16[64,128], index: 0, kind: input, shape index: {}]   ;;  %s359_s1 = inlined_call_operand.hbm [shape: bf16[8,64], index: 1, kind: input, shape index: {}]   ;;  %s360_s2 = inlined_call_operand.hbm [shape: f32[8,128], index: 2, kind: output, shape index: {0}]   ;;  %s361_s3 = inlined_call_operand.vmem [shape: f32[8,1], index: 3, kind: output, shape index: {1}]   ;;  %s362_s4 = inlined_call_operand.vmem [shape: f32[8,1], index: 4, kind: output, shape index: {2}]  }
   0x1   :  { %11 = vsyncpa [#allocation6], 0 }
   0x2   :  { %12 = vsyncpa [#allocation4], 0  ;;  %s268_s15 = smov [#allocation2]   ;;  %s196_s19 = scalar_lea.hbm %s358_s0, 512 }
   0x3   :  { %s18_s16 = sshll.u32 %s268_s15, 4  ;;  %p197_p0 = scmp.ne.s32.totalorder %s358_s0, %s196_s19  ;;  %s19_s16 = int_to_ptr.vmem [resolvable:$true] %s18_s16 }
   0x4   :  { %p200_p1 = scmp.lt.u32.totalorder %s196_s19, %s358_s0 }
   0x6   :  { %p202_p2 = pnand %p200_p1, %p197_p0 }
   0x8   :  { %205 = shalt.err (!%p202_p2)
}
   0x9   :  { %s206_s24 = scalar_lea.vmem %s19_s16, 512  ;;  %p211_p4 = scmp.lt.s32.totalorder %s19_s16, %s19_s16 }
   0xa   :  { %p207_p3 = scmp.ne.s32.totalorder %s19_s16, %s206_s24  ;;  %p212_p5 = scmp.lt.s32.totalorder %s206_s24, %s206_s24 }
   0xc   :  { %p213_p6 = por %p212_p5, %p211_p4 }
   0xe   :  { %p214_p7 = pnand %p213_p6, %p207_p3 }
  0x10   :  { %217 = shalt.err (!%p214_p7)
}
  0x11   :  { %s269_s25 = smov 64   ;;  %s270_s26 = smov 4  }
  0x12   :  { %24 = dma.hbm_to_vmem [thread:$0]  %s358_s0, 512, %s19_s16, [#allocation3], %s269_s25, %s269_s25, %s270_s26  }
  0x13   :  { %s271_s29 = smov [#allocation5]   ;;  %s218_s7 = scalar_lea.hbm %s359_s1, 64 }
  0x14   :  { %s31_s30 = sshll.u32 %s271_s29, 4  ;;  %p219_p8 = scmp.ne.s32.totalorder %s359_s1, %s218_s7  ;;  %s32_s30 = int_to_ptr.vmem [resolvable:$true] %s31_s30 }
  0x15   :  { %p222_p9 = scmp.lt.u32.totalorder %s218_s7, %s359_s1 }
  0x17   :  { %p224_p10 = pnand %p222_p9, %p219_p8 }
  0x19   :  { %227 = shalt.err (!%p224_p10)
}
  0x1a   :  { %s228_s12 = scalar_lea.vmem %s32_s30, 64  ;;  %p233_p12 = scmp.lt.s32.totalorder %s32_s30, %s32_s30 }
  0x1b   :  { %p229_p11 = scmp.ne.s32.totalorder %s32_s30, %s228_s12  ;;  %p234_p13 = scmp.lt.s32.totalorder %s228_s12, %s228_s12 }
  0x1d   :  { %p235_p0 = por %p234_p13, %p233_p12 }
  0x1f   :  { %p236_p1 = pnand %p235_p0, %p229_p11 }
  0x21   :  { %239 = shalt.err (!%p236_p1)
}
  0x22   :  { %34 = dma.hbm_to_vmem [thread:$0]  %s359_s1, 64, %s32_s30, [#allocation6]  }
  0x23   :  { %262 = dma.done.wait [#allocation3], 512  }
  0x24   :  { %263 = vsyncadd [#allocation3], 4294966784 }
  0x25   :  { %264 = dma.done.wait [#allocation6], 64  }
  0x26   :  { %265 = vsyncadd [#allocation6], 4294967232  ;;  %v272_v0 = vmov 0.0   ;;  %vm273_vm0 = vmmov 0   ;;  %v192_v1 = vld [vmem:[#allocation2] sm:$0xff]   ;;  %v193_v2 = vld [vmem:[#allocation2 + $0x8] sm:$0xff]  }
  0x27   :  { %173 = vmatprep.subr.bf16.mxu0 %v272_v0  ;;  %181 = vmatprep.mubr.msk.bf16.mxu0 %vm273_vm0, %v272_v0  ;;  %v194_v3 = vld [vmem:[#allocation2 + $0x10] sm:$0xff]   ;;  %v195_v4 = vld [vmem:[#allocation2 + $0x18] sm:$0xff]   ;;  %v42_v5 = vld [vmem:[#allocation5] sm:$0xf]  ;;  %vm75_vm1 = vcmask 523264   ;;  %vm124_vm2 = vcmask 7168  }
  0x28   :  { %174 = vmatpush3.bf16.msra.mxu0 %v192_v1  ;;  %125 = vst.msk [vmem:[%s361_s3] sm:$0xff] %vm124_vm2, %v272_v0  ;;  %126 = vst.msk [vmem:[%s362_s4] sm:$0xff] %vm124_vm2, %v272_v0  ;;  %s274_s17 = smov [#allocation7]  }
  0x29   :  { %175 = vmatprep.subr.bf16.mxu0 %v272_v0  ;;  %s145_s18 = sshll.u32 %s274_s17, 4  ;;  %s146_s18 = int_to_ptr.vmem [resolvable:$true] %s145_s18 }
  0x2a   :  { %s240_s19 = scalar_lea.vmem %s146_s18, 128  ;;  %p245_p3 = scmp.lt.s32.totalorder %s146_s18, %s146_s18 }
  0x2b   :  { %p241_p2 = scmp.ne.s32.totalorder %s146_s18, %s240_s19  ;;  %p246_p4 = scmp.lt.s32.totalorder %s240_s19, %s240_s19 }
  0x2c   :  { %176 = vmatpush3.bf16.msra.mxu0 %v193_v2 }
  0x2d   :  { %177 = vmatprep.subr.bf16.mxu0 %v272_v0  ;;  %p247_p5 = por %p246_p4, %p245_p3 }
  0x2f   :  { %p248_p6 = pnand %p247_p5, %p241_p2 }
  0x30   :  { %178 = vmatpush3.bf16.msra.mxu0 %v194_v3 }
  0x31   :  { %179 = vmatprep.subr.bf16.mxu0 %v272_v0 }
  0x34   :  { %180 = vmatpush3.bf16.msra.mxu0 %v195_v4 }
  0x37   :  { %182 = vmatmul.mubr.msk.bf16.vlgmr.msra.gmra.mrb[0].mxu0 %vm75_vm1, %v42_v5 }
 0x10a   :  { %v113_v6 = vpop.f32.mrb[0].mxu0 }
 0x10b   :  { %119 = vst [vmem:[#allocation7] sm:$0xff] %v113_v6  ;;  %128 = vadd.xlane.f32.xlu0 %v113_v6  ;;  %v183_v7 = vpop.f32.mrb[1].mxu0  ;;  %v134_v10 = vmul.f32 %v113_v6, %v113_v6 }
 0x10c   :  { %v116_v8 = vpop.f32.mrb[2].mxu0 }
 0x10d   :  { %v184_v9 = vpop.f32.mrb[3].mxu0 }
 0x10f   :  { %135 = vadd.xlane.f32.xlu0 %v134_v10 }
 0x110   :  { %251 = shalt.err (!%p248_p6)
}
 0x111   :  { %s252_s22 = scalar_lea.hbm %s360_s2, 128 }
 0x112   :  { %p253_p7 = scmp.ne.s32.totalorder %s360_s2, %s252_s22  ;;  %p256_p8 = scmp.lt.u32.totalorder %s252_s22, %s360_s2 }
 0x114   :  { %p258_p9 = pnand %p256_p8, %p253_p7 }
 0x116   :  { %261 = shalt.err (!%p258_p9)
}
 0x117   :  { %148 = dma.vmem_to_hbm [thread:$0]  %s146_s18, 128, %s360_s2, [#allocation4]   ;;  %v127_v11 = vld [vmem:[%s361_s3] sm:$0xff] }
 0x118   :  { %v133_v14 = vld [vmem:[%s362_s4] sm:$0xff] }
 0x198   :  { %v129_v12 = vpop.xlane.xlu0 %128 }
 0x199   :  { %v130_v13 = vadd.f32 %v129_v12, %v127_v11 }
 0x19b   :  { %132 = vst.msk [vmem:[%s361_s3] sm:$0xff] %vm124_vm2, %v130_v13 }
 0x19c   :  { %v136_v15 = vpop.xlane.xlu0 %135 }
 0x19d   :  { %v137_v16 = vadd.f32 %v136_v15, %v133_v14 }
 0x19f   :  { %138 = vst.msk [vmem:[%s362_s4] sm:$0xff] %vm124_vm2, %v137_v16 }
 0x1a0   :  { %266 = dma.done.wait [#allocation4], 128  }
 0x1a1   :  { %267 = vsyncadd [#allocation4], 4294967168 }
 0x1a2   :  { %160 = vsyncpa [#allocation3], 1 }
 0x1a3   :  { %161 = vsyncpa [#allocation6], 1 }
 0x1a4   :  { %162 = vsyncpa [#allocation4], 1 }

</bundles_post_ra>
